<compile_context>
chip_gen: v7x
topology: tpu7x:2x2x1
jax: 0.10.0
libtpu: 0.0.40
codegen_flags: <defaults>
</compile_context>

<pallas_src>
import functools

import jax
import jax.numpy as jnp
from jax import lax
from jax.experimental import pallas as pl
from jax.experimental.pallas import tpu as pltpu

IGNORE_INDEX = 255
SMOOTH = 1.0

_LANE = 128
_SUB = 8
_LOGITS_BLOCK_F32_BYTES = 2 * 1024 * 1024   # ~2 MiB f32 logits slab per grid step
_VMEM_LIMIT_BYTES = 40 * 1024 * 1024        # < v7x 64 MiB physical; raises v5e 16 MiB default


def _ce_dice_kernel(params_ref, logits_ref, tgt_ref,
                    ce_ref, valid_ref, inter_ref, psum_ref, tsum_ref,
                    *, hw, s_rows, tiles_per_super, p_split, ignore_index):
    t_local = pl.program_id(1)

    # Zero the per-(batch, superblock) accumulators at the first pixel tile.
    @pl.when(t_local == 0)
    def _():
        ce_ref[...] = jnp.zeros_like(ce_ref)
        valid_ref[...] = jnp.zeros_like(valid_ref)
        inter_ref[...] = jnp.zeros_like(inter_ref)
        psum_ref[...] = jnp.zeros_like(psum_ref)
        tsum_ref[...] = jnp.zeros_like(tsum_ref)

    logits = logits_ref[...].astype(jnp.float32)          # (C, S, 128)
    tgt = tgt_ref[...]                                     # (S, 128) int32
    c = logits.shape[0]

    # Ragged handling: pixels beyond H*W (wrapper zero-pad) are masked out.
    # Static no-op when the tiling covers H*W exactly.
    needs_mask = (p_split * tiles_per_super * s_rows * _LANE) != hw
    if needs_mask:
        if p_split > 1:
            g = pl.program_id(0)
            t_global = (g % p_split) * tiles_per_super + t_local
        else:
            t_global = t_local
        row = lax.broadcasted_iota(jnp.int32, (s_rows, _LANE), 0)
        lane = lax.broadcasted_iota(jnp.int32, (s_rows, _LANE), 1)
        mask = ((t_global * s_rows + row) * _LANE + lane) < hw
        maskf = mask.astype(jnp.float32)
        logits = jnp.where(mask[None], logits, 0.0)        # keep padded lanes finite

    # Numerically stable softmax pieces; class reductions run over the leading
    # dim of dense (S, 128) slabs (plain VPU adds/maxes).
    m = jnp.max(logits, axis=0)                            # (S, 128)
    shifted = logits - m[None]                             # (C, S, 128)
    ex = jnp.exp(shifted)                                  # (C, S, 128)
    denom = jnp.sum(ex, axis=0)                            # (S, 128)
    inv = pl.reciprocal(denom)                             # exact reciprocal
    logden = jnp.log(denom)                                # (S, 128)

    # DiceLoss ignore-index remap from the two prefetched scalars.
    remap_needed = params_ref[0]
    tgt_min = params_ref[1]
    dice_tgt = jnp.where((remap_needed != 0) & (tgt == ignore_index),
                         tgt_min, tgt)                     # (S, 128)
    classes = lax.broadcasted_iota(jnp.int32, logits.shape, 0)
    onehot = (classes == dice_tgt[None]).astype(jnp.float32)   # (C, S, 128)

    # Cross-entropy (reduction='mean', ignore_index).  The dice-remapped
    # one-hot is reused: wherever `valid` is 1, dice_tgt == tgt.
    picked = jnp.sum(shifted * onehot, axis=0)             # (S, 128)
    valid = (tgt != ignore_index).astype(jnp.float32)      # (S, 128)
    ce_term = (logden - picked) * valid                    # -log p[target]

    # Dice pieces without materializing probs = ex * inv.
    inter_term = jnp.sum(ex * onehot, axis=0) * inv        # (S, 128)
    psum_term = denom * inv                                # sum_c softmax (== ~1)
    tsum_term = ((dice_tgt >= 0) & (dice_tgt < c)).astype(jnp.float32)

    if needs_mask:
        ce_term = ce_term * maskf
        valid = valid * maskf
        inter_term = inter_term * maskf
        psum_term = psum_term * maskf
        tsum_term = tsum_term * maskf

    def fold(x):                                           # (S, 128) -> (8, 128)
        if s_rows > _SUB:
            return jnp.sum(x.reshape(s_rows // _SUB, _SUB, _LANE), axis=0)
        return x

    ce_ref[...] += fold(ce_term)
    valid_ref[...] += fold(valid)
    inter_ref[...] += fold(inter_term)
    psum_ref[...] += fold(psum_term)
    tsum_ref[...] += fold(tsum_term)


def ce_dice_loss(logits_nchw, target_nhw, smooth=SMOOTH, ignore_index=IGNORE_INDEX):
    n, c, h, w = logits_nchw.shape
    hw = h * w
    rows = -(-hw // _LANE)

    # Pixel tile: S sublane-rows of 128 lanes, ~2 MiB of f32 logits per step.
    budget_rows = _LOGITS_BLOCK_F32_BYTES // (c * _LANE * 4)
    s_rows = max(_SUB,
                 (min(budget_rows, -(-rows // _SUB) * _SUB) // _SUB) * _SUB)
    num_t = -(-rows // s_rows)

    # v7x: when N == 1, split the pixel axis into 2 superblocks so both
    # TensorCores get work through the "parallel" leading grid axis.
    p_split = 2 if (n == 1 and num_t >= 2) else 1
    tps = -(-num_t // p_split)
    rows_pad = p_split * tps * s_rows
    hw_pad = rows_pad * _LANE

    # DiceLoss ignore-index branching, computed on the UNPADDED targets:
    # remap ignore_index -> target.min() only when ignore_index is not in
    # range(target.min(), target.max()) AND it actually appears.
    t32 = target_nhw.astype(jnp.int32)
    tmin = jnp.min(t32)
    tmax = jnp.max(t32)
    in_range = (tmin <= ignore_index) & (ignore_index < tmax)
    has_ignore = jnp.any(t32 == ignore_index)
    remap = ((~in_range) & has_ignore).astype(jnp.int32)
    dice_params = jnp.stack([remap, tmin])                 # (2,) int32 -> SMEM

    # Free reshapes + (only if ragged) one zero-pad along the pixel axis.
    logits = logits_nchw.reshape(n, c, hw)
    tgt = t32.reshape(n, hw)
    if hw_pad != hw:
        logits = jnp.pad(logits, ((0, 0), (0, 0), (0, hw_pad - hw)))
        tgt = jnp.pad(tgt, ((0, 0), (0, hw_pad - hw)))
    logits = logits.reshape(n, c, rows_pad, _LANE)
    tgt = tgt.reshape(n, rows_pad, _LANE)

    if p_split == 1:
        logits_map = lambda g, t, prm: (g, 0, t, 0)
        tgt_map = lambda g, t, prm: (g, t, 0)
    else:
        logits_map = lambda g, t, prm: (g // p_split, 0,
                                        (g % p_split) * tps + t, 0)
        tgt_map = lambda g, t, prm: (g // p_split, (g % p_split) * tps + t, 0)

    part = jax.ShapeDtypeStruct((n * p_split, _SUB, _LANE), jnp.float32)
    kernel = functools.partial(
        _ce_dice_kernel, hw=hw, s_rows=s_rows, tiles_per_super=tps,
        p_split=p_split, ignore_index=ignore_index)

    outs = pl.pallas_call(
        kernel,
        out_shape=(part,) * 5,
        grid_spec=pltpu.PrefetchScalarGridSpec(
            num_scalar_prefetch=1,
            grid=(n * p_split, tps),
            in_specs=[
                pl.BlockSpec((None, c, s_rows, _LANE), logits_map),
                pl.BlockSpec((None, s_rows, _LANE), tgt_map),
            ],
            out_specs=[pl.BlockSpec((None, _SUB, _LANE),
                                    lambda g, t, prm: (g, 0, 0))] * 5,
        ),
        compiler_params=pltpu.CompilerParams(
            dimension_semantics=("parallel", "arbitrary"),
            vmem_limit_bytes=_VMEM_LIMIT_BYTES),
    )(dice_params, logits, tgt)

    ce_part, valid_part, inter_part, psum_part, tsum_part = outs
    ce_loss = jnp.sum(ce_part) / jnp.sum(valid_part)
    inter = jnp.sum(inter_part)
    union = jnp.sum(psum_part) + jnp.sum(tsum_part)
    dice_loss = 1.0 - (2.0 * inter + smooth) / (union + smooth)
    return ce_loss + dice_loss


def _reference_loss(logits_nchw, target_nhw, smooth=SMOOTH, ignore_index=IGNORE_INDEX):
    """Pure-JAX reference mirroring the PyTorch forward."""
    n, c, h, w = logits_nchw.shape
    logits = jnp.transpose(logits_nchw, (0, 2, 3, 1)).reshape(-1, c).astype(jnp.float32)
    tgt = target_nhw.reshape(-1).astype(jnp.int32)
    tmin = jnp.min(tgt)
    tmax = jnp.max(tgt)
    in_range = (tmin <= ignore_index) & (ignore_index < tmax)
    has_ignore = jnp.any(tgt == ignore_index)
    dice_tgt = jnp.where((~in_range) & has_ignore & (tgt == ignore_index), tmin, tgt)
    logp = jax.nn.log_softmax(logits, axis=-1)
    valid = (tgt != ignore_index)
    idx = jnp.clip(tgt, 0, c - 1)[:, None]
    ce = -jnp.take_along_axis(logp, idx, axis=-1)[:, 0]
    ce_loss = jnp.sum(jnp.where(valid, ce, 0.0)) / jnp.sum(valid.astype(jnp.float32))
    probs = jax.nn.softmax(logits, axis=-1)
    onehot = jax.nn.one_hot(dice_tgt, c, dtype=jnp.float32)
    inter = jnp.sum(probs * onehot)
    dice = 1.0 - (2.0 * inter + smooth) / (jnp.sum(probs) + jnp.sum(onehot) + smooth)
    return ce_loss + dice


if __name__ == "__main__":
    key = jax.random.PRNGKey(0)
    k1, k2, k3, k4 = jax.random.split(key, 4)
    loss_fn = jax.jit(ce_dice_loss)

    # Primary small case (NCHW logits + NHW integer targets).
    n, c, h, w = 2, 4, 16, 16
    logits = jax.random.normal(k1, (n, c, h, w), dtype=jnp.float32)
    target = jax.random.randint(k2, (n, h, w), 0, c, dtype=jnp.int32)
    out = jax.block_until_ready(loss_fn(logits, target))
    ref = jax.block_until_ready(_reference_loss(logits, target))
    assert jnp.allclose(out, ref, rtol=1e-5, atol=1e-5), (out, ref)

    # Second case: odd class count + ragged pixel tiling (exercises the
    # (S,128)->(8,128) fold and the in-kernel mask).
    n2, c2, h2, w2 = 1, 5, 48, 48
    logits2 = jax.random.normal(k3, (n2, c2, h2, w2), dtype=jnp.float32)
    target2 = jax.random.randint(k4, (n2, h2, w2), 0, c2, dtype=jnp.int32)
    out2 = jax.block_until_ready(loss_fn(logits2, target2))
    ref2 = jax.block_until_ready(_reference_loss(logits2, target2))
    assert jnp.allclose(out2, ref2, rtol=1e-5, atol=1e-5), (out2, ref2)

    print("KERNEL_OK")
</pallas_src>

<mosaic_0001>
module attributes {stable_mosaic.version = 11 : i64} {
  func.func @_ce_dice_kernel(%arg0: i32, %arg1: i32, %arg2: memref<2xi32, #tpu.memory_space<smem>>, %arg3: memref<1x4x8x128xf32, #tpu.memory_space<vmem>>, %arg4: memref<1x8x128xi32, #tpu.memory_space<vmem>>, %arg5: memref<1x8x128xf32, #tpu.memory_space<vmem>>, %arg6: memref<1x8x128xf32, #tpu.memory_space<vmem>>, %arg7: memref<1x8x128xf32, #tpu.memory_space<vmem>>, %arg8: memref<1x8x128xf32, #tpu.memory_space<vmem>>, %arg9: memref<1x8x128xf32, #tpu.memory_space<vmem>>) attributes {dimension_semantics = [#tpu.dimension_semantics<parallel>, #tpu.dimension_semantics<arbitrary>], iteration_bounds = array<i64: 2, 1>, scalar_prefetch = 1 : i64, scratch_operands = 0 : i64, tpu.core_type = #tpu.core_type<tc>, window_params = [{transform_indices = @transform_0, window_bounds = array<i64: 1, 4, 8, 128>}, {transform_indices = @transform_1, window_bounds = array<i64: 1, 8, 128>}, {transform_indices = @transform_2, window_bounds = array<i64: 1, 8, 128>}, {transform_indices = @transform_3, window_bounds = array<i64: 1, 8, 128>}, {transform_indices = @transform_4, window_bounds = array<i64: 1, 8, 128>}, {transform_indices = @transform_5, window_bounds = array<i64: 1, 8, 128>}, {transform_indices = @transform_6, window_bounds = array<i64: 1, 8, 128>}]} {
    %c0_i32 = arith.constant 0 : i32
    %0 = arith.cmpi eq, %arg1, %c0_i32 : i32
    %1 = arith.extui %0 : i1 to i32
    %c0_i32_0 = arith.constant 0 : i32
    %2 = arith.cmpi ne, %1, %c0_i32_0 : i32
    scf.if %2 {
      %cst_45 = arith.constant 0.000000e+00 : f32
      %101 = vector.broadcast %cst_45 : f32 to vector<8x128xf32>
      %c0_46 = arith.constant 0 : index
      %c0_47 = arith.constant 0 : index
      %c0_48 = arith.constant 0 : index
      %102 = vector.load %arg5[%c0_46, %c0_47, %c0_48] : memref<1x8x128xf32, #tpu.memory_space<vmem>>, vector<1x8x128xf32>
      %103 = vector.shape_cast %102 : vector<1x8x128xf32> to vector<8x128xf32>
      %104 = vector.shape_cast %101 : vector<8x128xf32> to vector<1x8x128xf32>
      tpu.vector_store %arg5[%c0_46, %c0_47, %c0_48], %104 {strides = array<i32>} : memref<1x8x128xf32, #tpu.memory_space<vmem>>, vector<1x8x128xf32>,
      %cst_49 = arith.constant 0.000000e+00 : f32
      %105 = vector.broadcast %cst_49 : f32 to vector<8x128xf32>
      %c0_50 = arith.constant 0 : index
      %c0_51 = arith.constant 0 : index
      %c0_52 = arith.constant 0 : index
      %106 = vector.load %arg6[%c0_50, %c0_51, %c0_52] : memref<1x8x128xf32, #tpu.memory_space<vmem>>, vector<1x8x128xf32>
      %107 = vector.shape_cast %106 : vector<1x8x128xf32> to vector<8x128xf32>
      %108 = vector.shape_cast %105 : vector<8x128xf32> to vector<1x8x128xf32>
      tpu.vector_store %arg6[%c0_50, %c0_51, %c0_52], %108 {strides = array<i32>} : memref<1x8x128xf32, #tpu.memory_space<vmem>>, vector<1x8x128xf32>,
      %cst_53 = arith.constant 0.000000e+00 : f32
      %109 = vector.broadcast %cst_53 : f32 to vector<8x128xf32>
      %c0_54 = arith.constant 0 : index
      %c0_55 = arith.constant 0 : index
      %c0_56 = arith.constant 0 : index
      %110 = vector.load %arg7[%c0_54, %c0_55, %c0_56] : memref<1x8x128xf32, #tpu.memory_space<vmem>>, vector<1x8x128xf32>
      %111 = vector.shape_cast %110 : vector<1x8x128xf32> to vector<8x128xf32>
      %112 = vector.shape_cast %109 : vector<8x128xf32> to vector<1x8x128xf32>
      tpu.vector_store %arg7[%c0_54, %c0_55, %c0_56], %112 {strides = array<i32>} : memref<1x8x128xf32, #tpu.memory_space<vmem>>, vector<1x8x128xf32>,
      %cst_57 = arith.constant 0.000000e+00 : f32
      %113 = vector.broadcast %cst_57 : f32 to vector<8x128xf32>
      %c0_58 = arith.constant 0 : index
      %c0_59 = arith.constant 0 : index
      %c0_60 = arith.constant 0 : index
      %114 = vector.load %arg8[%c0_58, %c0_59, %c0_60] : memref<1x8x128xf32, #tpu.memory_space<vmem>>, vector<1x8x128xf32>
      %115 = vector.shape_cast %114 : vector<1x8x128xf32> to vector<8x128xf32>
      %116 = vector.shape_cast %113 : vector<8x128xf32> to vector<1x8x128xf32>
      tpu.vector_store %arg8[%c0_58, %c0_59, %c0_60], %116 {strides = array<i32>} : memref<1x8x128xf32, #tpu.memory_space<vmem>>, vector<1x8x128xf32>,
      %cst_61 = arith.constant 0.000000e+00 : f32
      %117 = vector.broadcast %cst_61 : f32 to vector<8x128xf32>
      %c0_62 = arith.constant 0 : index
      %c0_63 = arith.constant 0 : index
      %c0_64 = arith.constant 0 : index
      %118 = vector.load %arg9[%c0_62, %c0_63, %c0_64] : memref<1x8x128xf32, #tpu.memory_space<vmem>>, vector<1x8x128xf32>
      %119 = vector.shape_cast %118 : vector<1x8x128xf32> to vector<8x128xf32>
      %120 = vector.shape_cast %117 : vector<8x128xf32> to vector<1x8x128xf32>
      tpu.vector_store %arg9[%c0_62, %c0_63, %c0_64], %120 {strides = array<i32>} : memref<1x8x128xf32, #tpu.memory_space<vmem>>, vector<1x8x128xf32>,
    } else {
    }
    %c0 = arith.constant 0 : index
    %c0_1 = arith.constant 0 : index
    %c0_2 = arith.constant 0 : index
    %c0_3 = arith.constant 0 : index
    %3 = vector.load %arg3[%c0, %c0_1, %c0_2, %c0_3] : memref<1x4x8x128xf32, #tpu.memory_space<vmem>>, vector<1x4x8x128xf32>
    %4 = vector.shape_cast %3 : vector<1x4x8x128xf32> to vector<4x8x128xf32>
    %c0_4 = arith.constant 0 : index
    %c0_5 = arith.constant 0 : index
    %c0_6 = arith.constant 0 : index
    %5 = vector.load %arg4[%c0_4, %c0_5, %c0_6] : memref<1x8x128xi32, #tpu.memory_space<vmem>>, vector<1x8x128xi32>
    %6 = vector.shape_cast %5 : vector<1x8x128xi32> to vector<8x128xi32>
    %7 = tpu.iota {dimensions = array<i32: 0>} : vector<8x128xi32>
    %8 = tpu.iota {dimensions = array<i32: 1>} : vector<8x128xi32>
    %c8_i32 = arith.constant 8 : i32
    %9 = arith.muli %arg1, %c8_i32 : i32
    %10 = vector.broadcast %9 : i32 to vector<8x128xi32>
    %11 = arith.addi %10, %7 : vector<8x128xi32>
    %c128_i32 = arith.constant 128 : i32
    %12 = vector.broadcast %c128_i32 : i32 to vector<8x128xi32>
    %13 = arith.muli %11, %12 : vector<8x128xi32>
    %14 = arith.addi %13, %8 : vector<8x128xi32>
    %c256_i32 = arith.constant 256 : i32
    %15 = vector.broadcast %c256_i32 : i32 to vector<8x128xi32>
    %16 = arith.cmpi slt, %14, %15 : vector<8x128xi32>
    %17 = arith.extui %16 : vector<8x128xi1> to vector<8x128xi32>
    %18 = arith.sitofp %17 : vector<8x128xi32> to vector<8x128xf32>
    %19 = vector.shape_cast %16 : vector<8x128xi1> to vector<1x8x128xi1>
    %cst = arith.constant 0.000000e+00 : f32
    %20 = vector.shape_cast %19 : vector<1x8x128xi1> to vector<1x8x128xi1>
    %21 = vector.broadcast %20 : vector<1x8x128xi1> to vector<4x8x128xi1>
    %22 = vector.broadcast %cst : f32 to vector<4x8x128xf32>
    %23 = arith.select %21, %4, %22 : vector<4x8x128xi1>, vector<4x8x128xf32>
    %cst_7 = arith.constant dense<0xFF800000> : vector<8x128xf32>
    %24 = vector.multi_reduction <maximumf>, %23, %cst_7 [0] : vector<4x8x128xf32> to vector<8x128xf32>
    %25 = vector.shape_cast %24 : vector<8x128xf32> to vector<1x8x128xf32>
    %26 = vector.broadcast %25 : vector<1x8x128xf32> to vector<4x8x128xf32>
    %27 = arith.subf %23, %26 : vector<4x8x128xf32>
    %28 = math.exp %27 : vector<4x8x128xf32>
    %cst_8 = arith.constant dense<0.000000e+00> : vector<8x128xf32>
    %29 = vector.multi_reduction <add>, %28, %cst_8 [0] : vector<4x8x128xf32> to vector<8x128xf32>
    %30 = tpu.reciprocal %29 : vector<8x128xf32> -> vector<8x128xf32>
    %31 = math.log %29 : vector<8x128xf32>
    %c0_9 = arith.constant 0 : index
    %32 = memref.load %arg2[%c0_9] : memref<2xi32, #tpu.memory_space<smem>>
    %c1 = arith.constant 1 : index
    %33 = memref.load %arg2[%c1] : memref<2xi32, #tpu.memory_space<smem>>
    %c0_i32_10 = arith.constant 0 : i32
    %34 = arith.cmpi ne, %32, %c0_i32_10 : i32
    %c255_i32 = arith.constant 255 : i32
    %35 = vector.broadcast %c255_i32 : i32 to vector<8x128xi32>
    %36 = arith.cmpi eq, %6, %35 : vector<8x128xi32>
    %37 = vector.broadcast %34 : i1 to vector<8x128xi1>
    %38 = arith.andi %37, %36 : vector<8x128xi1>
    %39 = vector.broadcast %33 : i32 to vector<8x128xi32>
    %40 = arith.select %38, %39, %6 : vector<8x128xi1>, vector<8x128xi32>
    %41 = tpu.iota {dimensions = array<i32: 0>} : vector<4x8x128xi32>
    %42 = vector.shape_cast %40 : vector<8x128xi32> to vector<1x8x128xi32>
    %43 = vector.broadcast %42 : vector<1x8x128xi32> to vector<4x8x128xi32>
    %44 = arith.cmpi eq, %41, %43 : vector<4x8x128xi32>
    %45 = arith.extui %44 : vector<4x8x128xi1> to vector<4x8x128xi32>
    %46 = arith.sitofp %45 : vector<4x8x128xi32> to vector<4x8x128xf32>
    %47 = arith.mulf %27, %46 : vector<4x8x128xf32>
    %cst_11 = arith.constant dense<0.000000e+00> : vector<8x128xf32>
    %48 = vector.multi_reduction <add>, %47, %cst_11 [0] : vector<4x8x128xf32> to vector<8x128xf32>
    %c255_i32_12 = arith.constant 255 : i32
    %49 = vector.broadcast %c255_i32_12 : i32 to vector<8x128xi32>
    %50 = arith.cmpi ne, %6, %49 : vector<8x128xi32>
    %51 = arith.extui %50 : vector<8x128xi1> to vector<8x128xi32>
    %52 = arith.sitofp %51 : vector<8x128xi32> to vector<8x128xf32>
    %53 = arith.subf %31, %48 : vector<8x128xf32>
    %54 = arith.mulf %53, %52 : vector<8x128xf32>
    %55 = arith.mulf %28, %46 : vector<4x8x128xf32>
    %cst_13 = arith.constant dense<0.000000e+00> : vector<8x128xf32>
    %56 = vector.multi_reduction <add>, %55, %cst_13 [0] : vector<4x8x128xf32> to vector<8x128xf32>
    %57 = arith.mulf %56, %30 : vector<8x128xf32>
    %58 = arith.mulf %29, %30 : vector<8x128xf32>
    %c0_i32_14 = arith.constant 0 : i32
    %59 = vector.broadcast %c0_i32_14 : i32 to vector<8x128xi32>
    %60 = arith.cmpi sge, %40, %59 : vector<8x128xi32>
    %c4_i32 = arith.constant 4 : i32
    %61 = vector.broadcast %c4_i32 : i32 to vector<8x128xi32>
    %62 = arith.cmpi slt, %40, %61 : vector<8x128xi32>
    %63 = arith.andi %60, %62 : vector<8x128xi1>
    %64 = arith.extui %63 : vector<8x128xi1> to vector<8x128xi32>
    %65 = arith.sitofp %64 : vector<8x128xi32> to vector<8x128xf32>
    %66 = arith.mulf %54, %18 : vector<8x128xf32>
    %67 = arith.mulf %52, %18 : vector<8x128xf32>
    %68 = arith.mulf %57, %18 : vector<8x128xf32>
    %69 = arith.mulf %58, %18 : vector<8x128xf32>
    %70 = arith.mulf %65, %18 : vector<8x128xf32>
    %c0_15 = arith.constant 0 : index
    %c0_16 = arith.constant 0 : index
    %c0_17 = arith.constant 0 : index
    %71 = vector.load %arg5[%c0_15, %c0_16, %c0_17] : memref<1x8x128xf32, #tpu.memory_space<vmem>>, vector<1x8x128xf32>
    %72 = vector.shape_cast %71 : vector<1x8x128xf32> to vector<8x128xf32>
    %73 = arith.addf %72, %66 : vector<8x128xf32>
    %c0_18 = arith.constant 0 : index
    %c0_19 = arith.constant 0 : index
    %c0_20 = arith.constant 0 : index
    %74 = vector.load %arg5[%c0_18, %c0_19, %c0_20] : memref<1x8x128xf32, #tpu.memory_space<vmem>>, vector<1x8x128xf32>
    %75 = vector.shape_cast %74 : vector<1x8x128xf32> to vector<8x128xf32>
    %76 = vector.shape_cast %73 : vector<8x128xf32> to vector<1x8x128xf32>
    tpu.vector_store %arg5[%c0_18, %c0_19, %c0_20], %76 {strides = array<i32>} : memref<1x8x128xf32, #tpu.memory_space<vmem>>, vector<1x8x128xf32>,
    %c0_21 = arith.constant 0 : index
    %c0_22 = arith.constant 0 : index
    %c0_23 = arith.constant 0 : index
    %77 = vector.load %arg6[%c0_21, %c0_22, %c0_23] : memref<1x8x128xf32, #tpu.memory_space<vmem>>, vector<1x8x128xf32>
    %78 = vector.shape_cast %77 : vector<1x8x128xf32> to vector<8x128xf32>
    %79 = arith.addf %78, %67 : vector<8x128xf32>
    %c0_24 = arith.constant 0 : index
    %c0_25 = arith.constant 0 : index
    %c0_26 = arith.constant 0 : index
    %80 = vector.load %arg6[%c0_24, %c0_25, %c0_26] : memref<1x8x128xf32, #tpu.memory_space<vmem>>, vector<1x8x128xf32>
    %81 = vector.shape_cast %80 : vector<1x8x128xf32> to vector<8x128xf32>
    %82 = vector.shape_cast %79 : vector<8x128xf32> to vector<1x8x128xf32>
    tpu.vector_store %arg6[%c0_24, %c0_25, %c0_26], %82 {strides = array<i32>} : memref<1x8x128xf32, #tpu.memory_space<vmem>>, vector<1x8x128xf32>,
    %c0_27 = arith.constant 0 : index
    %c0_28 = arith.constant 0 : index
    %c0_29 = arith.constant 0 : index
    %83 = vector.load %arg7[%c0_27, %c0_28, %c0_29] : memref<1x8x128xf32, #tpu.memory_space<vmem>>, vector<1x8x128xf32>
    %84 = vector.shape_cast %83 : vector<1x8x128xf32> to vector<8x128xf32>
    %85 = arith.addf %84, %68 : vector<8x128xf32>
    %c0_30 = arith.constant 0 : index
    %c0_31 = arith.constant 0 : index
    %c0_32 = arith.constant 0 : index
    %86 = vector.load %arg7[%c0_30, %c0_31, %c0_32] : memref<1x8x128xf32, #tpu.memory_space<vmem>>, vector<1x8x128xf32>
    %87 = vector.shape_cast %86 : vector<1x8x128xf32> to vector<8x128xf32>
    %88 = vector.shape_cast %85 : vector<8x128xf32> to vector<1x8x128xf32>
    tpu.vector_store %arg7[%c0_30, %c0_31, %c0_32], %88 {strides = array<i32>} : memref<1x8x128xf32, #tpu.memory_space<vmem>>, vector<1x8x128xf32>,
    %c0_33 = arith.constant 0 : index
    %c0_34 = arith.constant 0 : index
    %c0_35 = arith.constant 0 : index
    %89 = vector.load %arg8[%c0_33, %c0_34, %c0_35] : memref<1x8x128xf32, #tpu.memory_space<vmem>>, vector<1x8x128xf32>
    %90 = vector.shape_cast %89 : vector<1x8x128xf32> to vector<8x128xf32>
    %91 = arith.addf %90, %69 : vector<8x128xf32>
    %c0_36 = arith.constant 0 : index
    %c0_37 = arith.constant 0 : index
    %c0_38 = arith.constant 0 : index
    %92 = vector.load %arg8[%c0_36, %c0_37, %c0_38] : memref<1x8x128xf32, #tpu.memory_space<vmem>>, vector<1x8x128xf32>
    %93 = vector.shape_cast %92 : vector<1x8x128xf32> to vector<8x128xf32>
    %94 = vector.shape_cast %91 : vector<8x128xf32> to vector<1x8x128xf32>
    tpu.vector_store %arg8[%c0_36, %c0_37, %c0_38], %94 {strides = array<i32>} : memref<1x8x128xf32, #tpu.memory_space<vmem>>, vector<1x8x128xf32>,
    %c0_39 = arith.constant 0 : index
    %c0_40 = arith.constant 0 : index
    %c0_41 = arith.constant 0 : index
    %95 = vector.load %arg9[%c0_39, %c0_40, %c0_41] : memref<1x8x128xf32, #tpu.memory_space<vmem>>, vector<1x8x128xf32>
    %96 = vector.shape_cast %95 : vector<1x8x128xf32> to vector<8x128xf32>
    %97 = arith.addf %96, %70 : vector<8x128xf32>
    %c0_42 = arith.constant 0 : index
    %c0_43 = arith.constant 0 : index
    %c0_44 = arith.constant 0 : index
    %98 = vector.load %arg9[%c0_42, %c0_43, %c0_44] : memref<1x8x128xf32, #tpu.memory_space<vmem>>, vector<1x8x128xf32>
    %99 = vector.shape_cast %98 : vector<1x8x128xf32> to vector<8x128xf32>
    %100 = vector.shape_cast %97 : vector<8x128xf32> to vector<1x8x128xf32>
    tpu.vector_store %arg9[%c0_42, %c0_43, %c0_44], %100 {strides = array<i32>} : memref<1x8x128xf32, #tpu.memory_space<vmem>>, vector<1x8x128xf32>,
    return
  }
  func.func @transform_0(%arg0: i32, %arg1: i32, %arg2: memref<2xi32, #tpu.memory_space<smem>>) -> (i32, i32, i32, i32) {
    %c0_i32 = arith.constant 0 : i32
    %c0_i32_0 = arith.constant 0 : i32
    %c0_i32_1 = arith.constant 0 : i32
    return %arg0, %c0_i32, %arg1, %c0_i32_0 : i32, i32, i32, i32
  }
  func.func @transform_1(%arg0: i32, %arg1: i32, %arg2: memref<2xi32, #tpu.memory_space<smem>>) -> (i32, i32, i32) {
    %c0_i32 = arith.constant 0 : i32
    %c0_i32_0 = arith.constant 0 : i32
    return %arg0, %arg1, %c0_i32 : i32, i32, i32
  }
  func.func @transform_2(%arg0: i32, %arg1: i32, %arg2: memref<2xi32, #tpu.memory_space<smem>>) -> (i32, i32, i32) {
    %c0_i32 = arith.constant 0 : i32
    %c0_i32_0 = arith.constant 0 : i32
    %c0_i32_1 = arith.constant 0 : i32
    return %arg0, %c0_i32, %c0_i32_0 : i32, i32, i32
  }
  func.func @transform_3(%arg0: i32, %arg1: i32, %arg2: memref<2xi32, #tpu.memory_space<smem>>) -> (i32, i32, i32) {
    %c0_i32 = arith.constant 0 : i32
    %c0_i32_0 = arith.constant 0 : i32
    %c0_i32_1 = arith.constant 0 : i32
    return %arg0, %c0_i32, %c0_i32_0 : i32, i32, i32
  }
  func.func @transform_4(%arg0: i32, %arg1: i32, %arg2: memref<2xi32, #tpu.memory_space<smem>>) -> (i32, i32, i32) {
    %c0_i32 = arith.constant 0 : i32
    %c0_i32_0 = arith.constant 0 : i32
    %c0_i32_1 = arith.constant 0 : i32
    return %arg0, %c0_i32, %c0_i32_0 : i32, i32, i32
  }
  func.func @transform_5(%arg0: i32, %arg1: i32, %arg2: memref<2xi32, #tpu.memory_space<smem>>) -> (i32, i32, i32) {
    %c0_i32 = arith.constant 0 : i32
    %c0_i32_0 = arith.constant 0 : i32
    %c0_i32_1 = arith.constant 0 : i32
    return %arg0, %c0_i32, %c0_i32_0 : i32, i32, i32
  }
  func.func @transform_6(%arg0: i32, %arg1: i32, %arg2: memref<2xi32, #tpu.memory_space<smem>>) -> (i32, i32, i32) {
    %c0_i32 = arith.constant 0 : i32
    %c0_i32_0 = arith.constant 0 : i32
    %c0_i32_1 = arith.constant 0 : i32
    return %arg0, %c0_i32, %c0_i32_0 : i32, i32, i32
  }
}

</mosaic_0001>

<bundles_post_ra>
// kernel: ce_dice_loss.1
= control target key start
LH: loop header
LB: loop body
LE: loop exit
PB: predicated region body
PF: predicated region fallthrough
CT: control target
= control target key end

     0   :  { %s897_s0 = inlined_call_operand.vmem [shape: s32[2], index: 0, kind: input, shape index: {}]   ;;  %s898_s1 = inlined_call_operand.vmem [shape: f32[2,4,8,128], index: 1, kind: input, shape index: {}]   ;;  %s899_s2 = inlined_call_operand.vmem [shape: s32[2,8,128], index: 2, kind: input, shape index: {}]   ;;  %s900_s3 = inlined_call_operand.vmem [shape: f32[2,8,128], index: 3, kind: output, shape index: {0}]   ;;  %s901_s4 = inlined_call_operand.vmem [shape: f32[2,8,128], index: 4, kind: output, shape index: {1}]   ;;  %s902_s5 = inlined_call_operand.vmem [shape: f32[2,8,128], index: 5, kind: output, shape index: {2}]   ;;  %s903_s6 = inlined_call_operand.vmem [shape: f32[2,8,128], index: 6, kind: output, shape index: {3}]   ;;  %s904_s7 = inlined_call_operand.vmem [shape: f32[2,8,128], index: 7, kind: output, shape index: {4}]  }
   0x1   :  { %s13_s26 = sshll.u32 %s897_s0, 4  ;;  %s14_s26 = int_to_ptr.vmem [resolvable:$true] %s13_s26 }
   0x2   :  { %s737_s27 = scalar_lea.vmem %s14_s26, 16  ;;  %p742_p1 = scmp.lt.s32.totalorder %s14_s26, %s14_s26 }
   0x3   :  { %p738_p0 = scmp.ne.s32.totalorder %s14_s26, %s737_s27  ;;  %p743_p2 = scmp.lt.s32.totalorder %s737_s27, %s737_s27 }
   0x5   :  { %p744_p3 = por %p743_p2, %p742_p1 }
   0x7   :  { %p745_p4 = pnand %p744_p3, %p738_p0 }
   0x9   :  { %748 = shalt.err (!%p745_p4)  }
   0xa   :  { %s775_s28 = smov [#allocation3]  }
   0xb   :  { %16 = dma.vmem_to_smem %s14_s26, 16, %s775_s28, [#allocation2] }
   0xc   :  { %761 = dma.done.wait [#allocation2], 16 }
   0xd   :  { %762 = vsyncadd [#allocation2], 4294967280 }
   0xe   :  { %18 = sfence }
   0xf   :  { %s820_s29 = smov 0   ;;  %s822_s30 = smov 0  }
  0x10   :  { %s824_s8 = smov 0  }
  0x11 LB: > { %s36_s0 = sadd.s32 1, %s769_s30  ;;  %p679_p5 = scmp.ge.s32.totalorder %s773_s8, 1  ;;  %s773_s8 = sphi %s824_s8, %s24_s8   ;;  %s769_s30 = sphi %s822_s30, %s906_s30   ;;  %s765_s29 = sphi %s820_s29, %s905_s29  }
  0x12   : > { %p38_p6 = scmp.ge.s32.totalorder %s36_s0, 2  ;;  %p259_p7 = scmp.lt.s32.totalorder %s773_s8, 3 }
  0x14   : > { %s908_s0 = smov (%p38_p6, %s36_s0), 0  ;;  %p260_p8 = pnand %p679_p5, %p259_p7 }
  0x15   : > { %p314_p9 = scmp.lt.s32.totalorder (!%p260_p8), %s765_s29, 1  ;;  %v363_v0 = vlaneseq (!%p260_p8)  ;;  %s401_s9 = sld [smem:[#allocation3]] (!%p260_p8)  ;;  %v776_v10 = vmov (!%p260_p8), 0.0  }
  0x16   : > { %263 = sbr.rel (%p260_p8) target bundleno = 81 (0x51), region = 28  ;;  %s843_s15 = sld [smem:[#allocation3 + $0x1]] (!%p260_p8) }
  0x17   : > { %v364_v1 = vshrl.u32 (!%p260_p8), %v363_v0, 7  ;;  %v366_v2 = vand.u32 (!%p260_p8), 127, %v363_v0 }
  0x19   : > { %v370_v3 = vmul.u32 (!%p260_p8), 128, %v364_v1 }
  0x1b   : > { %v371_v7 = vadd.s32 (!%p260_p8), %v370_v3, %v366_v2  ;;  %p403_p10 = scmp.ne.s32.totalorder (!%p260_p8), %s401_s9, 0 }
  0x1c   : > { %v409_v30 = vstv (!%p260_p8), %s843_s15 }
  0x1d   : > { %s910_s29 = smov (!%p314_p9, %s765_s29), 1  ;;  %vm372_vm0 = vcmp.lt.s32.totalorder %v371_v7, 256 }
  0x1e   : > { %s698_s10 = sshll.u32 %s910_s29, 5  ;;  %s841_s14 = sshll.u32 %s910_s29, 3  ;;  %v850_v11 = vsel %vm372_vm0, 1.0, %v776_v10 }
  0x1f   : > { %s321_s13 = scalar_lea.vmem %s898_s1, %s698_s10  ;;  %s328_s18 = scalar_lea.vmem %s899_s2, %s841_s14 }
  0x20   : > { %v358_v4 = vld [vmem:[%s321_s13] sm:$0xff]  ;;  %v359_v5 = vld [vmem:[%s321_s13 + $0x8] sm:$0xff]  ;;  %v360_v6 = vld [vmem:[%s321_s13 + $0x10] sm:$0xff]  ;;  %s405_s19 = scalar_select %p403_p10, 1, 0 }
  0x21   : > { %v361_v8 = vld [vmem:[%s321_s13 + $0x18] sm:$0xff]  ;;  %v362_v9 = vld [vmem:[%s328_s18] sm:$0xff]  ;;  %v376_v12 = vsel %vm372_vm0, %v358_v4, 0.0  ;;  %v377_v13 = vsel %vm372_vm0, %v359_v5, 0.0  ;;  %v378_v14 = vsel %vm372_vm0, %v360_v6, 0.0  ;;  %s336_s22 = scalar_lea.vmem %s901_s4, %s841_s14  ;;  %s348_s25 = scalar_lea.vmem %s904_s7, %s841_s14 }
  0x22   : > { %v379_v15 = vsel %vm372_vm0, %v361_v8, 0.0  ;;  %v380_v16 = vmax.f32 %v376_v12, %v377_v13  ;;  %vm430_vm1 = vcmp.ne.s32.totalorder %v362_v9, 255  ;;  %v406_v19 = vstv %s405_s19  ;;  %s340_s28 = scalar_lea.vmem %s902_s5, %s841_s14  ;;  %s344_s10 = scalar_lea.vmem %s903_s6, %s841_s14 }
  0x23   : > { %v381_v17 = vmax.f32 %v378_v14, %v379_v15  ;;  %v853_v18 = vsel %vm430_vm1, 1.0, %v776_v10  ;;  %vm404_vm2 = vcmp.eq.s32.totalorder %v362_v9, 255  ;;  %vm407_vm3 = vcmp.eq.s32.totalorder %v406_v19, 1  ;;  %s332_s13 = scalar_lea.vmem %s900_s3, %s841_s14 }
  0x24   : > { %v450_v20 = vmul.f32 %v853_v18, %v850_v11  ;;  %vm408_vm4 = vmand %vm407_vm3, %vm404_vm2 }
  0x25   : > { %v382_v21 = vmax.f32 %v380_v16, %v381_v17  ;;  %v410_v31 = vsel %vm408_vm4, %v409_v30, %v362_v9 }
  0x26   : > { %459 = vst [vmem:[%s336_s22] sm:$0xff] %v450_v20  ;;  %vm444_vm5 = vcmp.ge.s32.totalorder %v410_v31, 0  ;;  %vm445_vm6 = vcmp.lt.s32.totalorder %v410_v31, 4  ;;  %vm411_vm8 = vcmp.eq.s32.totalorder %v410_v31, 0  ;;  %vm412_vm9 = vcmp.eq.s32.totalorder %v410_v31, 1 }
  0x27   : > { %v383_v22 = vsub.f32 %v376_v12, %v382_v21  ;;  %v384_v23 = vsub.f32 %v377_v13, %v382_v21  ;;  %v385_v24 = vsub.f32 %v378_v14, %v382_v21  ;;  %v386_v25 = vsub.f32 %v379_v15, %v382_v21  ;;  %vm446_vm7 = vmand %vm444_vm5, %vm445_vm6 }
  0x28   : > { %v695_v32 = vsel %vm446_vm7, 1.0, %v776_v10  ;;  %v690_v38 = vsel %vm411_vm8, 1.0, %v776_v10  ;;  %v691_v39 = vsel %vm412_vm9, 1.0, %v776_v10  ;;  %vm413_vm10 = vcmp.eq.s32.totalorder %v410_v31, 2 }
  0x29   : > { %v387_v26 = vmul.f32 1.442695, %v383_v22  ;;  %v389_v27 = vmul.f32 1.442695, %v384_v23  ;;  %v391_v28 = vmul.f32 1.442695, %v385_v24  ;;  %v453_v33 = vmul.f32 %v695_v32, %v850_v11 }
  0x2a   : > { %v393_v29 = vmul.f32 1.442695, %v386_v25  ;;  %v423_v44 = vmul.f32 %v690_v38, %v383_v22  ;;  %v424_v45 = vmul.f32 %v691_v39, %v384_v23  ;;  %v692_v47 = vsel %vm413_vm10, 1.0, %v776_v10 }
  0x2b   : > { %725 = vpow2.f32 %v387_v26  ;;  %468 = vst [vmem:[%s348_s25] sm:$0xff] %v453_v33  ;;  %vm414_vm11 = vcmp.eq.s32.totalorder %v410_v31, 3  ;;  %v425_v50 = vmul.f32 %v692_v47, %v385_v24 }
  0x2c   : > { %727 = vpow2.f32 %v389_v27  ;;  %v427_v51 = vadd.f32 %v424_v45, %v423_v44  ;;  %v693_v52 = vsel %vm414_vm11, 1.0, %v776_v10 }
  0x2d   : > { %729 = vpow2.f32 %v391_v28  ;;  %v426_v55 = vmul.f32 %v693_v52, %v386_v25 }
  0x2e   : > { %731 = vpow2.f32 %v393_v29  ;;  %v428_v56 = vadd.f32 %v427_v51, %v425_v50 }
  0x30   : > { %v429_v58 = vadd.f32 %v428_v56, %v426_v55 }
  0x35   : > { %v726_v34 = vpop.eup %725 }
  0x36   : > { %v728_v35 = vpop.eup %727  ;;  %v435_v42 = vmul.f32 %v726_v34, %v690_v38 }
  0x37   : > { %v730_v36 = vpop.eup %729  ;;  %v395_v37 = vadd.f32 %v728_v35, %v726_v34  ;;  %v436_v43 = vmul.f32 %v728_v35, %v691_v39 }
  0x38   : > { %v732_v40 = vpop.eup %731  ;;  %v437_v48 = vmul.f32 %v730_v36, %v692_v47 }
  0x39   : > { %v396_v41 = vadd.f32 %v730_v36, %v395_v37  ;;  %v439_v49 = vadd.f32 %v436_v43, %v435_v42  ;;  %v438_v53 = vmul.f32 %v732_v40, %v693_v52 }
  0x3b   : > { %v397_v46 = vadd.f32 %v732_v40, %v396_v41  ;;  %v440_v54 = vadd.f32 %v439_v49, %v437_v48 }
  0x3d   : > { %733 = vlog2.f32 %v397_v46  ;;  %v441_v57 = vadd.f32 %v440_v54, %v438_v53 }
  0x3e   : > { %735 = vrcp.f32 %v397_v46 }
  0x47   : > { %v734_v59 = vpop.eup %733 }
  0x48   : > { %v736_v60 = vpop.eup %735  ;;  %v400_v61 = vmul.f32 0.6931472, %v734_v59 }
  0x49   : > { %v442_v62 = vmul.f32 %v736_v60, %v441_v57  ;;  %v443_v63 = vmul.f32 %v736_v60, %v397_v46 }
  0x4a   : > { %v433_v0 = vsub.f32 %v400_v61, %v429_v58 }
  0x4b   : > { %v451_v1 = vmul.f32 %v850_v11, %v442_v62  ;;  %v452_v2 = vmul.f32 %v850_v11, %v443_v63 }
  0x4c   : > { %v434_v3 = vmul.f32 %v853_v18, %v433_v0 }
  0x4d   : > { %462 = vst [vmem:[%s340_s28] sm:$0xff] %v451_v1  ;;  %465 = vst [vmem:[%s344_s10] sm:$0xff] %v452_v2 }
  0x4e   : > { %v449_v4 = vmul.f32 %v850_v11, %v434_v3 }
  0x50   : > { %456 = vst [vmem:[%s332_s13] sm:$0xff] %v449_v4 }
  0x51 PF: > { %s24_s8 = sadd.s32 1, %s773_s8   ;;  %s905_s29 = smov %s769_s30 }
  0x52   : > { %p21_p11 = scmp.ge.s32.totalorder %s24_s8, 4   ;;  %s906_s30 = smov %s908_s0 }
  0x54   :  { %23 = sbr.rel (!%p21_p11) target bundleno = 17 (0x11), region = 113 }

</bundles_post_ra>
